<compile_context>
chip_gen: v7x
topology: tpu7x:2x2x1
jax: 0.10.0
libtpu: 0.0.40
codegen_flags: <defaults>
</compile_context>

<pallas_src>
import functools

import jax
import jax.numpy as jnp
from jax.experimental import pallas as pl
from jax.experimental.pallas import tpu as pltpu


def same_padding1d(seq_len, ks, stride=1, dilation=1):
    p = (seq_len - 1) * stride + (ks - 1) * dilation + 1 - seq_len
    return (p // 2, p - p // 2)


def _round_up(v, m):
    return (v + m - 1) // m * m


def _conv_stats_kernel(x_ref, w_ref, y_ref, stats_ref, *, ks, dilation, l_valid,
                       precision):
    """One batch element: bias-free conv + per-channel sum / sum-of-squares.

    x_ref     : (Cp, L128 + (ks-1)*dilation)  zero-padded input (f32 or bf16)
    w_ref     : (Fp, ks*Cp)                   conv weight, k-major / c-minor
    y_ref     : (Fp, L128)                    f32 conv output (no bias)
    stats_ref : (Fp, 2)                       [:,0]=sum, [:,1]=sum of squares
    """
    l_out = y_ref.shape[-1]
    x = x_ref[...]
    # im2col slab (ks*Cp, L128): row k*Cp + c holds x[c, l + k*dilation].
    cols = [x[:, k * dilation:k * dilation + l_out] for k in range(ks)]
    x2 = cols[0] if ks == 1 else jnp.concatenate(cols, axis=0)
    # Single MXU matmul contracting over ks*Cp (instead of ks shallow C-deep ones).
    y = jnp.dot(w_ref[...], x2, preferred_element_type=jnp.float32,
                precision=precision)
    y_ref[...] = y

    # BN batch statistics in f32, excluding the lane-padding columns (>= l_valid).
    lane = jax.lax.broadcasted_iota(jnp.int32, y.shape, 1)
    yv = jnp.where(lane < l_valid, y, 0.0)
    stats_ref[:, 0:1] = jnp.sum(yv, axis=1, keepdims=True)
    stats_ref[:, 1:2] = jnp.sum(yv * yv, axis=1, keepdims=True)


def _bn_act_kernel(y_ref, ss_ref, o_ref):
    """One batch element: folded BN affine (y * scale + shift) then ReLU."""
    a = ss_ref[:, 0:1]      # (Fp, 1)
    sh = ss_ref[:, 1:2]     # (Fp, 1)
    o_ref[...] = jnp.maximum(y_ref[...] * a + sh, 0.0).astype(o_ref.dtype)


def conv_block(x, w, b, gamma, beta, *, ks=3, stride=1, dilation=1, eps=1e-5,
               mxu_dtype=jnp.float32):
    """x: (N, ni, L) -> (N, nf, L) float32. Matches ConvBlock.forward (training BN)."""
    assert stride == 1, "ConvBlock default uses stride=1"
    _ = b  # conv bias cancels exactly under BatchNorm (removed by the batch mean)
    N, C, L = x.shape
    F = w.shape[0]

    is_bf16 = jnp.dtype(mxu_dtype) == jnp.dtype(jnp.bfloat16)
    sub = 16 if is_bf16 else 8
    Cp = _round_up(C, sub)          # sublane-aligned contraction channels
    Fp = _round_up(F, 8)            # sublane-aligned output channels (f32 out)
    L128 = _round_up(L, 128)        # lane-aligned sequence length
    halo = (ks - 1) * dilation
    L_in = L128 + halo
    p_left, _ = same_padding1d(L, ks, stride=stride, dilation=dilation)

    # Lay out the activation once: zero channels to Cp, TF-'same' left pad, right
    # pad to a lane-aligned L128 + halo (single fused XLA pad; halo lives here).
    # TODO(synk): for very long sequences also tile L with an in-kernel halo fetch.
    x_lay = jnp.pad(x.astype(mxu_dtype),
                    ((0, 0), (0, Cp - C), (p_left, L_in - L - p_left)))

    # Weight as a (Fp, ks*Cp) matmul operand, k-major so it matches the im2col slab.
    w_p = jnp.pad(w.astype(mxu_dtype), ((0, Fp - F), (0, Cp - C), (0, 0)))
    w2 = jnp.transpose(w_p, (0, 2, 1)).reshape(Fp, ks * Cp)

    precision = (jax.lax.Precision.HIGHEST if not is_bf16
                 else jax.lax.Precision.DEFAULT)
    kernel1 = functools.partial(_conv_stats_kernel, ks=ks, dilation=dilation,
                                l_valid=L, precision=precision)
    cparams = pltpu.CompilerParams(dimension_semantics=("parallel",),
                                   vmem_limit_bytes=32 * 1024 * 1024)

    # ---- pass 1: conv + per-sample BN partial sums ----
    y, stats = pl.pallas_call(
        kernel1,
        grid=(N,),
        in_specs=[
            pl.BlockSpec((None, Cp, L_in), lambda n: (n, 0, 0)),
            pl.BlockSpec((Fp, ks * Cp), lambda n: (0, 0)),
        ],
        out_specs=[
            pl.BlockSpec((None, Fp, L128), lambda n: (n, 0, 0)),
            pl.BlockSpec((None, Fp, 2), lambda n: (n, 0, 0)),
        ],
        out_shape=[
            jax.ShapeDtypeStruct((N, Fp, L128), jnp.float32),
            jax.ShapeDtypeStruct((N, Fp, 2), jnp.float32),
        ],
        compiler_params=cparams,
    )(x_lay, w2)

    # ---- glue: batch statistics -> folded per-channel affine (tiny, f32) ----
    totals = jnp.sum(stats, axis=0)                               # (Fp, 2)
    cnt = jnp.float32(N * L)
    mean = totals[:, 0] / cnt
    var = jnp.maximum(totals[:, 1] / cnt - mean * mean, 0.0)      # biased (training) var
    inv_std = jax.lax.rsqrt(var + jnp.float32(eps))
    g_p = jnp.pad(gamma.astype(jnp.float32), (0, Fp - F))
    be_p = jnp.pad(beta.astype(jnp.float32), (0, Fp - F))
    a = g_p * inv_std
    shift = be_p - mean * a
    ss = jnp.stack([a, shift], axis=1)                            # (Fp, 2)

    # ---- pass 2: normalize + ReLU (lane-dense stores) ----
    # NOTE: input_output_aliases={0: 0} could reuse the conv buffer in place.
    out = pl.pallas_call(
        _bn_act_kernel,
        grid=(N,),
        in_specs=[
            pl.BlockSpec((None, Fp, L128), lambda n: (n, 0, 0)),
            pl.BlockSpec((Fp, 2), lambda n: (0, 0)),
        ],
        out_specs=pl.BlockSpec((None, Fp, L128), lambda n: (n, 0, 0)),
        out_shape=jax.ShapeDtypeStruct((N, Fp, L128), jnp.float32),
        compiler_params=cparams,
    )(y, ss)

    return out[:, :F, :L]


if __name__ == "__main__":
    # Small shapes consistent with the module: batch=2, ni=4, nf=8, seq_len=16, ks=3
    N, ni, nf, L, ks = 2, 4, 8, 16, 3

    key = jax.random.PRNGKey(0)
    kx, kw, kb = jax.random.split(key, 3)

    x = jax.random.normal(kx, (N, ni, L), dtype=jnp.float32)
    w = jax.random.normal(kw, (nf, ni, ks), dtype=jnp.float32) * 0.1
    b = jax.random.normal(kb, (nf,), dtype=jnp.float32) * 0.1
    gamma = jnp.ones((nf,), dtype=jnp.float32)   # BatchNorm1d default init
    beta = jnp.zeros((nf,), dtype=jnp.float32)

    # Pure-JAX reference of the PyTorch module's forward (training-mode BN, with bias).
    hi = jax.lax.Precision.HIGHEST
    p_l, p_r = same_padding1d(L, ks)
    x_pad = jnp.pad(x, ((0, 0), (0, 0), (p_l, p_r)))
    ref = jnp.zeros((N, nf, L), jnp.float32)
    for k in range(ks):
        ref = ref + jnp.einsum('fc,ncl->nfl', w[:, :, k], x_pad[:, :, k:k + L],
                               precision=hi)
    ref = ref + b[None, :, None]
    mu = ref.mean(axis=(0, 2), keepdims=True)
    va = ((ref - mu) ** 2).mean(axis=(0, 2), keepdims=True)
    ref = (ref - mu) * jax.lax.rsqrt(va + 1e-5) * gamma[None, :, None] + beta[None, :, None]
    ref = jnp.maximum(ref, 0.0)

    # f32 MXU-operand path (exactness check).
    run_f32 = jax.jit(functools.partial(conv_block, ks=ks))
    out = jax.block_until_ready(run_f32(x, w, b, gamma, beta))
    assert out.shape == (N, nf, L)
    assert jnp.allclose(out, ref, atol=1e-4, rtol=1e-4), "f32 mismatch vs reference"

    # bf16 MXU-operand path (halves HBM/VMEM bytes on v6e/v7x; stats/normalize stay f32).
    run_bf16 = jax.jit(functools.partial(conv_block, ks=ks, mxu_dtype=jnp.bfloat16))
    out_bf16 = jax.block_until_ready(run_bf16(x, w, b, gamma, beta))
    assert out_bf16.shape == (N, nf, L)
    assert jnp.allclose(out_bf16, ref, atol=1e-1, rtol=1e-1), "bf16 mismatch vs reference"

    print("KERNEL_OK")
</pallas_src>

<mosaic_0001>
module attributes {stable_mosaic.version = 11 : i64} {
  func.func @_conv_stats_kernel(%arg0: i32, %arg1: memref<1x8x130xf32, #tpu.memory_space<vmem>>, %arg2: memref<8x24xf32, #tpu.memory_space<vmem>>, %arg3: memref<1x8x128xf32, #tpu.memory_space<vmem>>, %arg4: memref<1x8x2xf32, #tpu.memory_space<vmem>>) attributes {dimension_semantics = [#tpu.dimension_semantics<parallel>], iteration_bounds = array<i64: 2>, scalar_prefetch = 0 : i64, scratch_operands = 0 : i64, tpu.core_type = #tpu.core_type<tc>, window_params = [{transform_indices = @transform_0, window_bounds = array<i64: 1, 8, 130>}, {pipeline_mode = #tpu.pipeline_mode<synchronous>, transform_indices = @transform_1, window_bounds = array<i64: 8, 24>}, {transform_indices = @transform_2, window_bounds = array<i64: 1, 8, 128>}, {transform_indices = @transform_3, window_bounds = array<i64: 1, 8, 2>}]} {
    %c0 = arith.constant 0 : index
    %c0_0 = arith.constant 0 : index
    %c0_1 = arith.constant 0 : index
    %0 = vector.load %arg1[%c0, %c0_0, %c0_1] : memref<1x8x130xf32, #tpu.memory_space<vmem>>, vector<1x8x130xf32>
    %1 = vector.shape_cast %0 : vector<1x8x130xf32> to vector<8x130xf32>
    %2 = vector.extract_strided_slice %1 {offsets = [0, 0], sizes = [8, 128], strides = [1, 1]} : vector<8x130xf32> to vector<8x128xf32>
    %3 = vector.extract_strided_slice %1 {offsets = [0, 1], sizes = [8, 128], strides = [1, 1]} : vector<8x130xf32> to vector<8x128xf32>
    %4 = vector.extract_strided_slice %1 {offsets = [0, 2], sizes = [8, 128], strides = [1, 1]} : vector<8x130xf32> to vector<8x128xf32>
    %5 = tpu.concatenate %2, %3, %4 in 0 : vector<8x128xf32>, vector<8x128xf32>, vector<8x128xf32> -> vector<24x128xf32>
    %c0_2 = arith.constant 0 : index
    %c0_3 = arith.constant 0 : index
    %6 = vector.load %arg2[%c0_2, %c0_3] : memref<8x24xf32, #tpu.memory_space<vmem>>, vector<8x24xf32>
    %cst = arith.constant dense<0.000000e+00> : vector<8x128xf32>
    %7 = tpu.matmul %6, %5, %cst {dimension_numbers = #tpu.dot_dimension_numbers<[1], [0], [0], [1], [0, 0, 1, 1], [], []>, precision = #tpu.contract_precision<fp32>} : vector<8x24xf32>, vector<24x128xf32>, vector<8x128xf32> -> vector<8x128xf32>
    %c0_4 = arith.constant 0 : index
    %c0_5 = arith.constant 0 : index
    %c0_6 = arith.constant 0 : index
    %8 = vector.load %arg3[%c0_4, %c0_5, %c0_6] : memref<1x8x128xf32, #tpu.memory_space<vmem>>, vector<1x8x128xf32>
    %9 = vector.shape_cast %8 : vector<1x8x128xf32> to vector<8x128xf32>
    %10 = vector.shape_cast %7 : vector<8x128xf32> to vector<1x8x128xf32>
    tpu.vector_store %arg3[%c0_4, %c0_5, %c0_6], %10 {strides = array<i32>} : memref<1x8x128xf32, #tpu.memory_space<vmem>>, vector<1x8x128xf32>,
    %11 = tpu.iota {dimensions = array<i32: 1>} : vector<8x128xi32>
    %c16_i32 = arith.constant 16 : i32
    %12 = vector.broadcast %c16_i32 : i32 to vector<8x128xi32>
    %13 = arith.cmpi slt, %11, %12 : vector<8x128xi32>
    %cst_7 = arith.constant 0.000000e+00 : f32
    %14 = vector.broadcast %cst_7 : f32 to vector<8x128xf32>
    %15 = arith.select %13, %7, %14 : vector<8x128xi1>, vector<8x128xf32>
    %cst_8 = arith.constant dense<0.000000e+00> : vector<8xf32>
    %16 = vector.multi_reduction <add>, %15, %cst_8 [1] : vector<8x128xf32> to vector<8xf32>
    %17 = vector.shape_cast %16 : vector<8xf32> to vector<8x1xf32>
    %c0_9 = arith.constant 0 : index
    %c0_10 = arith.constant 0 : index
    %c0_11 = arith.constant 0 : index
    %18 = vector.load %arg4[%c0_9, %c0_10, %c0_11] : memref<1x8x2xf32, #tpu.memory_space<vmem>>, vector<1x8x1xf32>
    %19 = vector.shape_cast %18 : vector<1x8x1xf32> to vector<8x1xf32>
    %20 = vector.shape_cast %17 : vector<8x1xf32> to vector<1x8x1xf32>
    tpu.vector_store %arg4[%c0_9, %c0_10, %c0_11], %20 {strides = array<i32>} : memref<1x8x2xf32, #tpu.memory_space<vmem>>, vector<1x8x1xf32>,
    %21 = arith.mulf %15, %15 : vector<8x128xf32>
    %cst_12 = arith.constant dense<0.000000e+00> : vector<8xf32>
    %22 = vector.multi_reduction <add>, %21, %cst_12 [1] : vector<8x128xf32> to vector<8xf32>
    %23 = vector.shape_cast %22 : vector<8xf32> to vector<8x1xf32>
    %c0_13 = arith.constant 0 : index
    %c0_14 = arith.constant 0 : index
    %c1 = arith.constant 1 : index
    %24 = vector.load %arg4[%c0_13, %c0_14, %c1] : memref<1x8x2xf32, #tpu.memory_space<vmem>>, vector<1x8x1xf32>
    %25 = vector.shape_cast %24 : vector<1x8x1xf32> to vector<8x1xf32>
    %26 = vector.shape_cast %23 : vector<8x1xf32> to vector<1x8x1xf32>
    tpu.vector_store %arg4[%c0_13, %c0_14, %c1], %26 {strides = array<i32>} : memref<1x8x2xf32, #tpu.memory_space<vmem>>, vector<1x8x1xf32>,
    return
  }
  func.func @transform_0(%arg0: i32) -> (i32, i32, i32) {
    %c0_i32 = arith.constant 0 : i32
    %c0_i32_0 = arith.constant 0 : i32
    %c0_i32_1 = arith.constant 0 : i32
    return %arg0, %c0_i32, %c0_i32_0 : i32, i32, i32
  }
  func.func @transform_1(%arg0: i32) -> (i32, i32) {
    %c0_i32 = arith.constant 0 : i32
    %c0_i32_0 = arith.constant 0 : i32
    %c0_i32_1 = arith.constant 0 : i32
    return %c0_i32, %c0_i32_0 : i32, i32
  }
  func.func @transform_2(%arg0: i32) -> (i32, i32, i32) {
    %c0_i32 = arith.constant 0 : i32
    %c0_i32_0 = arith.constant 0 : i32
    %c0_i32_1 = arith.constant 0 : i32
    return %arg0, %c0_i32, %c0_i32_0 : i32, i32, i32
  }
  func.func @transform_3(%arg0: i32) -> (i32, i32, i32) {
    %c0_i32 = arith.constant 0 : i32
    %c0_i32_0 = arith.constant 0 : i32
    %c0_i32_1 = arith.constant 0 : i32
    return %arg0, %c0_i32, %c0_i32_0 : i32, i32, i32
  }
}

module attributes {stable_mosaic.version = 11 : i64} {
  func.func @_bn_act_kernel(%arg0: i32, %arg1: memref<1x8x128xf32, #tpu.memory_space<vmem>>, %arg2: memref<8x2xf32, #tpu.memory_space<vmem>>, %arg3: memref<1x8x128xf32, #tpu.memory_space<vmem>>) attributes {dimension_semantics = [#tpu.dimension_semantics<parallel>], iteration_bounds = array<i64: 2>, scalar_prefetch = 0 : i64, scratch_operands = 0 : i64, tpu.core_type = #tpu.core_type<tc>, window_params = [{transform_indices = @transform_0, window_bounds = array<i64: 1, 8, 128>}, {pipeline_mode = #tpu.pipeline_mode<synchronous>, transform_indices = @transform_1, window_bounds = array<i64: 8, 2>}, {transform_indices = @transform_2, window_bounds = array<i64: 1, 8, 128>}]} {
    %c0 = arith.constant 0 : index
    %c0_0 = arith.constant 0 : index
    %0 = vector.load %arg2[%c0, %c0_0] : memref<8x2xf32, #tpu.memory_space<vmem>>, vector<8x1xf32>
    %c0_1 = arith.constant 0 : index
    %c1 = arith.constant 1 : index
    %1 = vector.load %arg2[%c0_1, %c1] : memref<8x2xf32, #tpu.memory_space<vmem>>, vector<8x1xf32>
    %c0_2 = arith.constant 0 : index
    %c0_3 = arith.constant 0 : index
    %c0_4 = arith.constant 0 : index
    %2 = vector.load %arg1[%c0_2, %c0_3, %c0_4] : memref<1x8x128xf32, #tpu.memory_space<vmem>>, vector<1x8x128xf32>
    %3 = vector.shape_cast %2 : vector<1x8x128xf32> to vector<8x128xf32>
    %4 = vector.broadcast %0 : vector<8x1xf32> to vector<8x128xf32>
    %5 = arith.mulf %3, %4 : vector<8x128xf32>
    %6 = vector.broadcast %1 : vector<8x1xf32> to vector<8x128xf32>
    %7 = arith.addf %5, %6 : vector<8x128xf32>
    %cst = arith.constant 0.000000e+00 : f32
    %8 = vector.broadcast %cst : f32 to vector<8x128xf32>
    %9 = arith.maximumf %7, %8 : vector<8x128xf32>
    %c0_5 = arith.constant 0 : index
    %c0_6 = arith.constant 0 : index
    %c0_7 = arith.constant 0 : index
    %10 = vector.load %arg3[%c0_5, %c0_6, %c0_7] : memref<1x8x128xf32, #tpu.memory_space<vmem>>, vector<1x8x128xf32>
    %11 = vector.shape_cast %10 : vector<1x8x128xf32> to vector<8x128xf32>
    %12 = vector.shape_cast %9 : vector<8x128xf32> to vector<1x8x128xf32>
    tpu.vector_store %arg3[%c0_5, %c0_6, %c0_7], %12 {strides = array<i32>} : memref<1x8x128xf32, #tpu.memory_space<vmem>>, vector<1x8x128xf32>,
    return
  }
  func.func @transform_0(%arg0: i32) -> (i32, i32, i32) {
    %c0_i32 = arith.constant 0 : i32
    %c0_i32_0 = arith.constant 0 : i32
    %c0_i32_1 = arith.constant 0 : i32
    return %arg0, %c0_i32, %c0_i32_0 : i32, i32, i32
  }
  func.func @transform_1(%arg0: i32) -> (i32, i32) {
    %c0_i32 = arith.constant 0 : i32
    %c0_i32_0 = arith.constant 0 : i32
    %c0_i32_1 = arith.constant 0 : i32
    return %c0_i32, %c0_i32_0 : i32, i32
  }
  func.func @transform_2(%arg0: i32) -> (i32, i32, i32) {
    %c0_i32 = arith.constant 0 : i32
    %c0_i32_0 = arith.constant 0 : i32
    %c0_i32_1 = arith.constant 0 : i32
    return %arg0, %c0_i32, %c0_i32_0 : i32, i32, i32
  }
}

</mosaic_0001>

<bundles_post_ra>
// kernel: conv_block.3
= control target key start
LH: loop header
LB: loop body
LE: loop exit
PB: predicated region body
PF: predicated region fallthrough
CT: control target
= control target key end

     0   :  { %7 = vsyncpa [#allocation3], 0  ;;  %s465_s0 = inlined_call_operand.vmem [shape: f32[2,8,128], index: 0, kind: input, shape index: {}]   ;;  %s466_s1 = inlined_call_operand.vmem [shape: f32[8,2], index: 1, kind: input, shape index: {}]   ;;  %s467_s2 = inlined_call_operand.hbm [shape: f32[2,8,128], index: 2, kind: output, shape index: {}]  }
   0x1   :  { %9 = vsyncpa [#allocation3 + $0x1], 0  ;;  %s362_s9 = smov 0   ;;  %s364_s10 = smov 0  }
   0x2   :  { %s366_s11 = smov 0   ;;  %s368_s12 = smov 0  }
   0x3 LB: > { %s383_s13 = sadd.s32 4294967295, %s342_s12   ;;  %s227_s14 = sadd.s32 4294967294, %s342_s12   ;;  %s342_s12 = sphi %s368_s12, %s473_s12   ;;  %s338_s11 = sphi %s366_s11, %s472_s11   ;;  %s334_s10 = sphi %s364_s10, %s471_s10   ;;  %s330_s9 = sphi %s362_s9, %s470_s9  }
   0x4   : > { %s387_s15 = sadd.s32 1, %s342_s12   ;;  %s69_s16 = sadd.s32 1, %s338_s11 }
   0x5   : > { %s66_s17 = ssub.s32 %s342_s12, %s387_s15  ;;  %p79_p0 = scmp.ne.s32.totalorder %s338_s11, %s334_s10 }
   0x6   : > { %p67_p1 = scmp.eq.s32.totalorder %s66_s17, 0  ;;  %p80_p2 = scmp.eq.s32.totalorder %s383_s13, 1 }
   0x7   : > { %p85_p3 = scmp.ne.s32.totalorder %s334_s10, %s330_s9  ;;  %p86_p4 = scmp.eq.s32.totalorder %s227_s14, 1 }
   0x8   : > { %s398_s18 = scalar_select %p67_p1, %s338_s11, %s69_s16  }
   0x9   : > { %p400_p5 = por %p80_p2, %p79_p0  ;;  %p404_p6 = por %p86_p4, %p85_p3 }
   0xa   : > { %p230_p7 = scmp.ge.s32.totalorder %s342_s12, 1  ;;  %p114_p8 = scmp.lt.s32.totalorder %s342_s12, 3 }
   0xc   : > { %p115_p9 = pnand %p230_p7, %p114_p8 }
   0xd   : > { %v139_v0 = vld [vmem:[%s466_s1] sm:$0xff] (!%p115_p9)  ;;  %v344_v1 = vmov (!%p115_p9), 0   ;;  %v345_v2 = vmov (!%p115_p9), 1   ;;  %p135_p10 = scmp.lt.s32.totalorder (!%p115_p9), %s383_s13, 1  ;;  %s132_s25 = sand.u32 (!%p115_p9), 1, %s334_s10  }
   0xe   : > { %118 = sbr.rel (%p115_p9) target bundleno = 166 (0xa6), region = 28  ;;  %278 = vset.pattern.permute.xlu0 (!%p115_p9), %v344_v1  ;;  %s231_s29 = sshll.u32 (!%p115_p9), %s132_s25, 3 }
   0xf   : > { %143 = vperm.xlu0 (!%p115_p9), %278, %v139_v0   ;;  %s234_s30 = sshll.u32 (!%p115_p9), %s383_s13, 7  ;;  %s134_s3 = scalar_lea.vmem (!%p115_p9), [#allocation2], %s231_s29 }
  0x10   : > { %s168_s4 = sshll.u32 (!%p115_p9), %s134_s3, 4  ;;  %s423_s7 = scalar_lea.hbm (!%p115_p9), %s467_s2, %s234_s30  ;;  %s425_s4 = int_to_ptr.vmem [resolvable:$true] %s168_s4 }
  0x11   : > { %s155_s8 = scalar_lea.sflag (!%p115_p9), [#allocation3], %s132_s25  ;;  %s280_s14 = scalar_lea.vmem (!%p115_p9), %s425_s4, 128 }
  0x12   : > { %p281_p11 = scmp.ne.s32.totalorder (!%p115_p9), %s425_s4, %s280_s14 }
  0x13   : > { %279 = vset.pattern.permute.xlu0 (!%p115_p9), %v345_v2 }
  0x14   : > { %148 = vperm.xlu0 (!%p115_p9), %279, %v139_v0   ;;  %p282_p12 = pnand (!%p115_p9), %p281_p11, %p400_p5 }
  0x15   : > { %s136_s23 = scalar_select %p135_p10, %s383_s13, 1 }
  0x16   : > { %p283_p13 = pneg %p282_p12  ;;  %s346_s13 = smov [#allocation2]  }
  0x17   : > { %s232_s24 = sshll.u32 %s136_s23, 3  ;;  %s284_s16 = sshll.u32 %s346_s13, 4  ;;  %s285_s16 = int_to_ptr.vmem [resolvable:$false] %s284_s16 }
  0x18   : > { %s138_s28 = scalar_lea.vmem %s465_s0, %s232_s24  ;;  %s286_s17 = scalar_lea.vmem %s285_s16, 256 }
  0x19   : > { %v140_v4 = vld [vmem:[%s138_s28] sm:$0xff]  ;;  %p287_p0 = scmp.lt.s32.totalorder %s425_s4, %s285_s16  ;;  %p288_p1 = scmp.lt.s32.totalorder %s286_s17, %s280_s14 }
  0x1b   : > { %p289_p2 = por %p288_p1, %p287_p0 }
  0x1d   : > { %p290_p3 = pnand %p289_p2, %p283_p13 }
  0x8e   : > { %v144_v3 = vpop.permute.xlu0 %143 }
  0x8f   : > { %v146_v5 = vmul.f32 %v144_v3, %v140_v4 }
  0x93   : > { %v149_v6 = vpop.permute.xlu0 %148 }
  0x94   : > { %v151_v7 = vadd.f32 %v149_v6, %v146_v5 }
  0x96   : > { %v152_v8 = vmax.f32 %v151_v7, 0.0 }
  0x98   : > { %153 = vst [vmem:[%s134_s3] sm:$0xff] %v152_v8 }
  0x99   : > { %293 = shalt.err (!%p290_p3)
}
  0x9a   : > { %s294_s21 = scalar_lea.hbm %s423_s7, 128  ;;  %s298_s24 = scalar_lea.hbm %s467_s2, 256 }
  0x9b   : > { %p295_p4 = scmp.ne.s32.totalorder %s423_s7, %s294_s21  ;;  %p299_p9 = scmp.lt.u32.totalorder %s423_s7, %s467_s2 }
  0x9c   : > { %p300_p10 = scmp.lt.u32.totalorder %s298_s24, %s294_s21  ;;  %p302_p12 = scmp.lt.u32.totalorder %s294_s21, %s423_s7 }
  0x9d   : > { %p296_p7 = pnand %p295_p4, %p400_p5 }
  0x9e   : > { %p301_p11 = por %p300_p10, %p299_p9 }
  0x9f   : > { %p297_p8 = pneg %p296_p7 }
  0xa0   : > { %p303_p13 = por %p302_p12, %p301_p11 }
  0xa2   : > { %p304_p0 = pnand %p303_p13, %p297_p8 }
  0xa4   : > { %307 = shalt.err (!%p304_p0)
}
  0xa5   : > { %237 = dma.vmem_to_hbm [thread:$0]  (%p400_p5), %s425_s4, 128, %s423_s7, %s155_s8  }
  0xa6 PF: > { %p243_p1 = scmp.ge.s32.totalorder %s342_s12, 2  ;;  %s180_s27 = sand.u32 1, %s330_s9  }
  0xa7   : > { %s181_s28 = scalar_lea.sflag [#allocation3], %s180_s27 }
  0xa8   : > { %p240_p2 = pnand %p243_p1, %p404_p6 }
  0xaa   : > { %325 = dma.done.wait (!%p240_p2), %s181_s28, 128  }
  0xab   : > { %327 = vsyncadd (!%p240_p2), %s181_s28, 4294967168  ;;  %p12_p3 = scmp.ge.s32.totalorder %s387_s15, 4   ;;  %s470_s9 = smov %s334_s10 }
  0xac   : > { %s471_s10 = smov %s338_s11  ;;  %s472_s11 = smov %s398_s18 }
  0xad   : > { %s473_s12 = smov %s387_s15  ;;  %14 = sbr.rel (!%p12_p3) target bundleno = 3 (0x3), region = 63 }
  0xb4   :  { %186 = vsyncpa [#allocation3], 1 }
  0xb5   :  { %188 = vsyncpa [#allocation3 + $0x1], 1 }

// kernel: conv_block.2
= control target key start
LH: loop header
LB: loop body
LE: loop exit
PB: predicated region body
PF: predicated region fallthrough
CT: control target
= control target key end

     0   :  { %s936_s12 = smov 0   ;;  %s987_s0 = inlined_call_operand.vmem [shape: f32[2,8,130], index: 0, kind: input, shape index: {}]   ;;  %s988_s1 = inlined_call_operand.vmem [shape: f32[8,24], index: 1, kind: input, shape index: {}]   ;;  %s989_s2 = inlined_call_operand.vmem [shape: f32[2,8,128], index: 2, kind: output, shape index: {0}]   ;;  %s990_s3 = inlined_call_operand.vmem [shape: f32[2,8,2], index: 3, kind: output, shape index: {1}]  }
   0x1 LB: > { %s773_s13 = sadd.s32 4294967295, %s909_s12   ;;  %p777_p0 = scmp.ge.s32.totalorder %s909_s12, 1  ;;  %s909_s12 = sphi %s936_s12, %s14_s12  }
   0x2   : > { %p140_p1 = scmp.lt.s32.totalorder %s909_s12, 3 }
   0x4   : > { %p141_p2 = pnand %p777_p0, %p140_p1 }
   0x5   : > { %p167_p3 = scmp.lt.s32.totalorder (!%p141_p2), %s773_s13, 1  ;;  %v911_v0 = vmov (!%p141_p2), 0.0|0.0   ;;  %s912_s18 = smov (!%p141_p2), 126   ;;  %vm914_vm0 = vmmov (!%p141_p2), 0   ;;  %v915_v3 = vmov (!%p141_p2), 0.0   ;;  %v198_v4 = vld [vmem:[%s988_s1] sm:$0xff] (!%p141_p2)  ;;  %v676_v36 = vlaneseq (!%p141_p2) }
   0x6   : > { %144 = sbr.rel (%p141_p2) target bundleno = 523 (0x20b), region = 28  ;;  %863 = vmatprep.subr.bf16.mxu1 (!%p141_p2), %v911_v0  ;;  %872 = vmatprep.subr.bf16.mxu0 (!%p141_p2), %v911_v0  ;;  %s913_s19 = smov (!%p141_p2), 127   ;;  %vm199_vm1 = vcmask (!%p141_p2), 195584   ;;  %vm195_vm2 = vcmask (!%p141_p2), 1031168   ;;  %vm188_vm3 = vcmask (!%p141_p2), 1039360   ;;  %vm682_vm5 = vcmask (!%p141_p2), 7168  }
   0x7   : > { %815 = vmatprep.mubr.msk.f32.mxu1 (!%p141_p2), %vm914_vm0, %v915_v3  ;;  %842 = vmatprep.mubr.msk.f32.mxu0 (!%p141_p2), %vm914_vm0, %v915_v3  ;;  %v201_v5 = vsel (!%p141_p2), %vm199_vm1, %v198_v4, 0  ;;  %v677_v37 = vand.u32 (!%p141_p2), 127, %v676_v36  ;;  %vm687_vm6 = vcmask (!%p141_p2), 15368  }
   0x8   : > { %v271_v6 = vand.u32 (!%p141_p2), 4294901760, %v201_v5 }
   0x9   : > { %vm678_vm4 = vcmp.lt.s32.totalorder (!%p141_p2), %v677_v37, 16 }
   0xa   : > { %v272_v8 = vsub.f32 (!%p141_p2), %v201_v5, %v271_v6 }
   0xc   : > { %v273_v12 = vand.u32 (!%p141_p2), 4294901760, %v272_v8 }
   0xd   : > { %s992_s13 = smov (!%p167_p3, %s773_s13), 1 }
   0xe   : > { %s784_s14 = sshll.u32 %s992_s13, 4  ;;  %v274_v20 = vsub.f32 %v272_v8, %v273_v12  ;;  %s780_s22 = sshll.u32 %s992_s13, 3 }
   0xf   : > { %s171_s17 = scalar_lea.vmem %s987_s0, %s784_s14  ;;  %s175_s25 = scalar_lea.vmem %s989_s2, %s780_s22 }
  0x10   : > { %v180_v1 = vld [vmem:[%s171_s17] sm:$0xff]  ;;  %v181_v2 = vld [vmem:[%s171_s17 + $0x8] sm:$0xff]  ;;  %v275_v26 = vand.u32 4294901760, %v274_v20  ;;  %s179_s28 = scalar_lea.vmem %s990_s3, %s780_s22 }
  0x11   : > { %191 = vrot.lane.b32.xlu1 %v180_v1, %s912_s18  ;;  %184 = vrot.lane.b32.xlu0 %v180_v1, %s913_s19  ;;  %v204_v7 = vand.u32 4294901760, %v180_v1 }
  0x13   : > { %v283_v11 = vsub.f32 %v180_v1, %v204_v7 }
  0x15   : > { %193 = vrot.lane.b32.xlu1 %v181_v2, %s912_s18  ;;  %186 = vrot.lane.b32.xlu0 %v181_v2, %s913_s19  ;;  %v284_v15 = vand.u32 4294901760, %v283_v11 }
  0x17   : > { %v285_v24 = vsub.f32 %v283_v11, %v284_v15 }
  0x19   : > { %v286_v29 = vand.u32 4294901760, %v285_v24 }
  0x83   : > { %v192_v9 = vpop.permute.xlu1 %191  ;;  %v185_v10 = vpop.permute.xlu0 %184 }
  0x87   : > { %v194_v13 = vpop.permute.xlu1 %193  ;;  %v187_v14 = vpop.permute.xlu0 %186 }
  0x88   : > { %v196_v16 = vsel %vm195_vm2, %v192_v9, %v194_v13  ;;  %v189_v17 = vsel %vm188_vm3, %v185_v10, %v187_v14 }
  0x89   : > { %v210_v18 = vand.u32 4294901760, %v196_v16  ;;  %v207_v19 = vand.u32 4294901760, %v189_v17 }
  0x8b   : > { %v297_v21 = vsub.f32 %v196_v16, %v210_v18  ;;  %v290_v22 = vsub.f32 %v189_v17, %v207_v19  ;;  %v864_v23 = vpack.c.bf16 %v207_v19, %v204_v7 }
  0x8d   : > { %v291_v25 = vand.u32 4294901760, %v290_v22  ;;  %865 = vmatpush3.bf16.msra.mxu1 %v864_v23  ;;  %874 = vmatpush3.bf16.msra.mxu0 %v864_v23  ;;  %v298_v27 = vand.u32 4294901760, %v297_v21  ;;  %v870_v35 = vpack.c.bf16 %v290_v22, %v283_v11 }
  0x8e   : > { %813 = vmatprep.subr.mxu1 %v915_v3  ;;  %840 = vmatprep.subr.mxu0 %v915_v3 }
  0x8f   : > { %v292_v28 = vsub.f32 %v290_v22, %v291_v25  ;;  %v876_v31 = vpack.c.bf16 %v291_v25, %v284_v15  ;;  %v299_v32 = vsub.f32 %v297_v21, %v298_v27 }
  0x91   : > { %v293_v30 = vand.u32 4294901760, %v292_v28  ;;  %814 = vmatpush3.msra.mxu1 %v210_v18  ;;  %841 = vmatpush3.msra.mxu0 %v210_v18  ;;  %v300_v34 = vand.u32 4294901760, %v299_v32 }
  0x92   : > { %816 = vmatmul.mubr.f32.vlgmr.msra.gmra.mrb[0].mxu1 %v275_v26  ;;  %843 = vmatmul.mubr.f32.vlgmr.msra.gmra.mrb[0].mxu0 %v273_v12 }
  0x93   : > { %875 = vmatprep.subr.bf16.mxu0 %v911_v0  ;;  %866 = vmatprep.subr.bf16.mxu1 %v911_v0  ;;  %v867_v33 = vpack.c.bf16 %v293_v30, %v286_v29 }
  0x94   : > { %877 = vmatpush3.bf16.msra.mxu0 %v876_v31  ;;  %824 = vmatprep.mubr.msk.f32.mxu1 %vm914_vm0, %v915_v3 }
  0x95   : > { %868 = vmatpush3.bf16.msra.mxu1 %v867_v33  ;;  %849 = vmatprep.subr.mxu0 %v915_v3 }
  0x96   : > { %822 = vmatprep.subr.mxu1 %v915_v3  ;;  %851 = vmatprep.mubr.msk.f32.mxu0 %vm914_vm0, %v915_v3 }
  0x98   : > { %850 = vmatpush3.msra.mxu0 %v298_v27 }
  0x99   : > { %823 = vmatpush3.msra.mxu1 %v300_v34  ;;  %878 = vmatprep.subr.bf16.mxu0 %v911_v0 }
  0x9a   : > { %825 = vmatmul.mubr.f32.vlgmr.msra.gmra.mrb[0].mxu1 %v271_v6  ;;  %869 = vmatprep.subr.bf16.mxu1 %v911_v0 }
  0x9b   : > { %852 = vmatmul.mubr.f32.vlgmr.msra.gmra.mrb[0].mxu0 %v271_v6  ;;  %871 = vmatpush3.bf16.msra.mxu1 %v870_v35 }
  0x9c   : > { %880 = vmatpush3.bf16.msra.mxu0 %v864_v23  ;;  %831 = vmatprep.subr.mxu1 %v915_v3 }
  0x9d   : > { %858 = vmatprep.subr.mxu0 %v915_v3  ;;  %833 = vmatprep.mubr.msk.f32.mxu1 %vm914_vm0, %v915_v3 }
  0x9e   : > { %860 = vmatprep.mubr.msk.f32.mxu0 %vm914_vm0, %v915_v3 }
  0x9f   : > { %832 = vmatpush3.msra.mxu1 %v297_v21 }
  0xa0   : > { %859 = vmatpush3.msra.mxu0 %v210_v18 }
  0xa2   : > { %834 = vmatmul.mubr.f32.vlgmr.msra.gmra.mrb[0].mxu1 %v272_v8 }
  0xa3   : > { %861 = vmatmul.mubr.f32.vlgmr.msra.gmra.mrb[0].mxu0 %v271_v6 }
 0x175   : > { %v441_v38 = vpop.f32.mrb[0].mxu1 }
 0x176   : > { %v671_v39 = vpop.f32.mrb[0].mxu0  ;;  %v835_v40 = vpop.f32.mrb[1].mxu1 }
 0x177   : > { %v881_v41 = vadd.f32 %v671_v39, %v441_v38  ;;  %v862_v42 = vpop.f32.mrb[1].mxu0 }
 0x179   : > { %675 = vst [vmem:[%s175_s25] sm:$0xff] %v881_v41  ;;  %v679_v43 = vsel %vm678_vm4, %v881_v41, 0.0 }
 0x17a   : > { %680 = vadd.xlane.f32.xlu0 %v679_v43  ;;  %v684_v44 = vmul.f32 %v679_v43, %v679_v43 }
 0x17c   : > { %685 = vadd.xlane.f32.xlu1 %v684_v44 }
 0x207   : > { %v681_v45 = vpop.xlane.xlu0 %680 }
 0x208   : > { %683 = vst.msk [vmem:[%s179_s28] sm:$0xff] %vm682_vm5, %v681_v45 }
 0x209   : > { %v686_v46 = vpop.xlane.xlu1 %685 }
 0x20a   : > { %688 = vst.msk [vmem:[%s179_s28] sm:$0xff] %vm687_vm6, %v686_v46 }
 0x20b PF: > { %s14_s12 = sadd.s32 1, %s909_s12  }
 0x20c   : > { %p11_p4 = scmp.ge.s32.totalorder %s14_s12, 4  }
 0x20e   :  { %13 = sbr.rel (!%p11_p4) target bundleno = 1 (0x1), region = 70 }

</bundles_post_ra>
